<compile_context>
chip_gen: v7x
topology: tpu7x:2x2x1
jax: 0.10.0
libtpu: 0.0.40
codegen_flags: <defaults>
</compile_context>

<pallas_src>
import math

import jax
import jax.numpy as jnp
from jax.experimental import pallas as pl
from jax.experimental.pallas import tpu as pltpu


def _round_up(x, m):
    return ((x + m - 1) // m) * m


# ----------------------------- kernel bodies --------------------------------

def _support_kernel(x_ref, w_ref, s_ref):
    # support = X @ W   (bf16 operands, f32 MXU accumulation, bf16 result:
    # it is only consumed as an MXU operand by the aggregate kernel).
    s_ref[...] = jnp.dot(
        x_ref[...], w_ref[...], preferred_element_type=jnp.float32
    ).astype(s_ref.dtype)


def _make_aggregate_kernel(tk, support_resident):
    """output = adj @ support (+ bias); contraction over grid axis 2.

    The output block is resident across the contraction axis and serves as the
    f32 accumulator (no separate scratch).  When `support_resident`, s_ref is
    the full (n_pad, tn) column slab and we slice the current tk rows.
    """

    def kernel(adj_ref, s_ref, b_ref, o_ref):
        k = pl.program_id(2)

        @pl.when(k == 0)
        def _():
            o_ref[...] = jnp.zeros_like(o_ref)

        if support_resident:
            row = pl.multiple_of(k * tk, tk)
            s_tile = s_ref[pl.ds(row, tk), :]
        else:
            s_tile = s_ref[...]

        o_ref[...] += jnp.dot(
            adj_ref[...], s_tile, preferred_element_type=jnp.float32
        )

        @pl.when(k == pl.num_programs(2) - 1)
        def _():
            o_ref[...] += b_ref[...]          # bias add in f32, lane-dense store

    return kernel


# ------------------------------- wrapper -------------------------------------

def graph_convolution(x, adj, weight, bias=None):
    """Pallas GCN layer: adj @ (x @ weight) [+ bias].

    x:      (N, F_in)     float
    adj:    (N, N)        float (normalized adjacency)
    weight: (F_in, F_out) float
    bias:   (F_out,) or None
    returns (N, F_out)    float32
    """
    n, f_in = x.shape
    f_out = weight.shape[1]

    # ---- tiling / padding plan ------------------------------------------
    f_in_pad = _round_up(f_in, 128)
    f_out_pad = _round_up(f_out, 128)
    if f_out_pad <= 512:
        tn = f_out_pad                        # single column tile: adj read once
    else:
        tn = 512                              # MXU N-granularity on v6e/v7x
        f_out_pad = _round_up(f_out_pad, tn)

    if n <= 256:
        n_pad = _round_up(n, 16)              # bf16 sublane packing
        tm = tk = n_pad                       # whole (padded) node axis per tile
    else:
        n_pad = _round_up(n, 256)             # 256-granularity node padding
        tk = 512 if n_pad % 512 == 0 else 256
        tm = 256
        for cand in (1024, 512):              # biggest row tile that divides n_pad
            if n_pad % cand == 0:
                tm = cand
                break
        # v7x has 2 TensorCores: keep >= 2 parallel output tiles when possible.
        while tm > 256 and (n_pad // tm) * (f_out_pad // tn) < 2:
            tm //= 2

    # Kernel-1 row tile: shrink if F_in is very wide so its blocks stay small.
    tm1 = tm
    while tm1 > 256 and 2 * (tm1 * f_in_pad * 2 + f_in_pad * tn * 2
                             + tm1 * tn * 2) > 24 * 1024 * 1024:
        tm1 //= 2

    # Resident support column slab if it fits comfortably (double-buffered).
    support_resident = (n_pad * tn * 2 * 2) <= (16 * 1024 * 1024)

    # ---- pad operands (zero padding keeps both matmuls exact) ------------
    x_p = jnp.zeros((n_pad, f_in_pad), jnp.bfloat16).at[:n, :f_in].set(
        x.astype(jnp.bfloat16))
    adj_p = jnp.zeros((n_pad, n_pad), jnp.bfloat16).at[:n, :n].set(
        adj.astype(jnp.bfloat16))
    w_p = jnp.zeros((f_in_pad, f_out_pad), jnp.bfloat16).at[:f_in, :f_out].set(
        weight.astype(jnp.bfloat16))
    b_p = jnp.zeros((1, f_out_pad), jnp.float32)
    if bias is not None:
        b_p = b_p.at[0, :f_out].set(bias.astype(jnp.float32))

    vmem_limit = 32 * 1024 * 1024             # fits scoped VMEM on v5e/v6e/v7x
    n_col_tiles = f_out_pad // tn

    # ---- kernel 1: support = X @ W  (computed once, hoisted) -------------
    support = pl.pallas_call(
        _support_kernel,
        out_shape=jax.ShapeDtypeStruct((n_pad, f_out_pad), jnp.bfloat16),
        grid=(n_pad // tm1, n_col_tiles),
        in_specs=[
            pl.BlockSpec((tm1, f_in_pad), lambda i, j: (i, 0)),   # x rows
            pl.BlockSpec((f_in_pad, tn), lambda i, j: (0, j)),    # weight cols
        ],
        out_specs=pl.BlockSpec((tm1, tn), lambda i, j: (i, j)),
        compiler_params=pltpu.CompilerParams(
            dimension_semantics=("parallel", "parallel"),
            vmem_limit_bytes=vmem_limit,
        ),
        cost_estimate=pl.CostEstimate(
            flops=2 * n_pad * f_in_pad * f_out_pad,
            transcendentals=0,
            bytes_accessed=(n_col_tiles * n_pad * f_in_pad * 2          # x re-reads
                            + (n_pad // tm1) * f_in_pad * f_out_pad * 2  # w re-reads
                            + n_pad * f_out_pad * 2),                    # support out
        ),
    )(x_p, w_p)

    # ---- kernel 2: out = adj @ support + bias  (tiled, accumulated) -------
    if support_resident:
        # Column tile j is the OUTER grid axis; the (n_pad, tn) support slab is
        # DMA'd only when j changes -> support read from HBM exactly once.
        grid2 = (n_col_tiles, n_pad // tm, n_pad // tk)
        in_specs2 = [
            pl.BlockSpec((tm, tk), lambda j, i, k: (i, k)),       # adj tile
            pl.BlockSpec((n_pad, tn), lambda j, i, k: (0, j)),    # resident slab
            pl.BlockSpec((1, tn), lambda j, i, k: (0, j)),        # bias tile
        ]
        out_spec2 = pl.BlockSpec((tm, tn), lambda j, i, k: (i, j))
        sup_bytes = n_pad * f_out_pad * 2
    else:
        grid2 = (n_pad // tm, n_col_tiles, n_pad // tk)
        in_specs2 = [
            pl.BlockSpec((tm, tk), lambda i, j, k: (i, k)),       # adj tile
            pl.BlockSpec((tk, tn), lambda i, j, k: (k, j)),       # support tile
            pl.BlockSpec((1, tn), lambda i, j, k: (0, j)),        # bias tile
        ]
        out_spec2 = pl.BlockSpec((tm, tn), lambda i, j, k: (i, j))
        sup_bytes = (n_pad // tm) * n_pad * f_out_pad * 2
    adj_bytes = n_col_tiles * n_pad * n_pad * 2

    out_p = pl.pallas_call(
        _make_aggregate_kernel(tk, support_resident),
        out_shape=jax.ShapeDtypeStruct((n_pad, f_out_pad), jnp.float32),
        grid=grid2,
        in_specs=in_specs2,
        out_specs=out_spec2,
        compiler_params=pltpu.CompilerParams(
            dimension_semantics=("parallel", "parallel", "arbitrary"),
            vmem_limit_bytes=vmem_limit,
        ),
        cost_estimate=pl.CostEstimate(
            flops=2 * n_pad * n_pad * f_out_pad,
            transcendentals=0,
            bytes_accessed=(adj_bytes + sup_bytes
                            + f_out_pad * 4 + n_pad * f_out_pad * 4),
        ),
    )(adj_p, support, b_p)

    # strip padding
    return out_p[:n, :f_out]


# ------------------------- parameter initialization --------------------------

def init_gcn_params(key, in_features, out_features, bias=True):
    """Matches GraphConvolution.reset_parameters(): U(-stdv, stdv),
    stdv = 1/sqrt(out_features)."""
    stdv = 1.0 / math.sqrt(out_features)
    k_w, k_b = jax.random.split(key)
    weight = jax.random.uniform(
        k_w, (in_features, out_features), jnp.float32, minval=-stdv, maxval=stdv
    )
    b = None
    if bias:
        b = jax.random.uniform(
            k_b, (out_features,), jnp.float32, minval=-stdv, maxval=stdv
        )
    return weight, b


def _make_adj(key, n):
    """Deterministic symmetric row-normalized adjacency."""
    raw = jax.random.uniform(key, (n, n), jnp.float32)
    adj_bin = (raw > 0.5).astype(jnp.float32)
    adj_sym = jnp.maximum(adj_bin, adj_bin.T) + jnp.eye(n, dtype=jnp.float32)
    return adj_sym / jnp.sum(adj_sym, axis=1, keepdims=True)


# ----------------------------------- demo ------------------------------------

if __name__ == "__main__":
    key = jax.random.PRNGKey(0)
    ok = True

    # Case 1: tiny shapes (single-tile path).
    k_x, k_adj, k_p, key = jax.random.split(key, 4)
    N, F_IN, F_OUT = 8, 16, 32
    x = jax.random.normal(k_x, (N, F_IN), jnp.float32)
    adj = _make_adj(k_adj, N)
    weight, bias = init_gcn_params(k_p, F_IN, F_OUT, bias=True)

    out = jax.block_until_ready(graph_convolution(x, adj, weight, bias))
    ref = adj @ (x @ weight) + bias[None, :]
    ok &= out.shape == (N, F_OUT)
    ok &= bool(jnp.allclose(out, ref, atol=2e-2, rtol=2e-2))  # bf16 MXU operands

    # Case 2: larger shapes (multi-tile path: 256-granular node padding,
    # resident support slab, tk=512).
    k_x, k_adj, k_p = jax.random.split(key, 3)
    N2, F_IN2, F_OUT2 = 300, 48, 160
    x2 = jax.random.normal(k_x, (N2, F_IN2), jnp.float32)
    adj2 = _make_adj(k_adj, N2)
    weight2, bias2 = init_gcn_params(k_p, F_IN2, F_OUT2, bias=True)

    out2 = jax.block_until_ready(graph_convolution(x2, adj2, weight2, bias2))
    ref2 = adj2 @ (x2 @ weight2) + bias2[None, :]
    ok &= out2.shape == (N2, F_OUT2)
    ok &= bool(jnp.allclose(out2, ref2, atol=2e-2, rtol=2e-2))

    if ok:
        print("KERNEL_OK")
    else:
        print("KERNEL_MISMATCH")
</pallas_src>

<mosaic_0001>
module attributes {stable_mosaic.version = 11 : i64} {
  func.func @_support_kernel(%arg0: i32, %arg1: i32, %arg2: memref<16x128xbf16, #tpu.memory_space<vmem>>, %arg3: memref<128x128xbf16, #tpu.memory_space<vmem>>, %arg4: memref<16x128xbf16, #tpu.memory_space<vmem>>) attributes {dimension_semantics = [#tpu.dimension_semantics<parallel>, #tpu.dimension_semantics<parallel>], iteration_bounds = array<i64: 1, 1>, scalar_prefetch = 0 : i64, scratch_operands = 0 : i64, tpu.core_type = #tpu.core_type<tc>, window_params = [{transform_indices = @transform_0, window_bounds = array<i64: 16, 128>}, {transform_indices = @transform_1, window_bounds = array<i64: 128, 128>}, {transform_indices = @transform_2, window_bounds = array<i64: 16, 128>}]} {
    %c0 = arith.constant 0 : index
    %c0_0 = arith.constant 0 : index
    %0 = vector.load %arg2[%c0, %c0_0] : memref<16x128xbf16, #tpu.memory_space<vmem>>, vector<16x128xbf16>
    %c0_1 = arith.constant 0 : index
    %c0_2 = arith.constant 0 : index
    %1 = vector.load %arg3[%c0_1, %c0_2] : memref<128x128xbf16, #tpu.memory_space<vmem>>, vector<128x128xbf16>
    %cst = arith.constant dense<0.000000e+00> : vector<16x128xf32>
    %2 = tpu.matmul %0, %1, %cst {dimension_numbers = #tpu.dot_dimension_numbers<[1], [0], [0], [1], [0, 0, 1, 1], [], []>} : vector<16x128xbf16>, vector<128x128xbf16>, vector<16x128xf32> -> vector<16x128xf32>
    %3 = arith.truncf %2 : vector<16x128xf32> to vector<16x128xbf16>
    %c0_3 = arith.constant 0 : index
    %c0_4 = arith.constant 0 : index
    %4 = vector.load %arg4[%c0_3, %c0_4] : memref<16x128xbf16, #tpu.memory_space<vmem>>, vector<16x128xbf16>
    tpu.vector_store %arg4[%c0_3, %c0_4], %3 {strides = array<i32>} : memref<16x128xbf16, #tpu.memory_space<vmem>>, vector<16x128xbf16>,
    return
  }
  func.func @transform_0(%arg0: i32, %arg1: i32) -> (i32, i32) {
    %c0_i32 = arith.constant 0 : i32
    %c0_i32_0 = arith.constant 0 : i32
    return %arg0, %c0_i32 : i32, i32
  }
  func.func @transform_1(%arg0: i32, %arg1: i32) -> (i32, i32) {
    %c0_i32 = arith.constant 0 : i32
    %c0_i32_0 = arith.constant 0 : i32
    return %c0_i32, %arg1 : i32, i32
  }
  func.func @transform_2(%arg0: i32, %arg1: i32) -> (i32, i32) {
    %c0_i32 = arith.constant 0 : i32
    return %arg0, %arg1 : i32, i32
  }
}

</mosaic_0001>

<bundles_post_ra>
// kernel: tpu_custom_call.1
= control target key start
LH: loop header
LB: loop body
LE: loop exit
PB: predicated region body
PF: predicated region fallthrough
CT: control target
= control target key end

     0   :  { %7 = vsyncpa [#allocation3], 0  ;;  %s384_s0 = inlined_call_operand.hbm [shape: bf16[16,128], index: 0, kind: input, shape index: {}]   ;;  %s385_s1 = inlined_call_operand.hbm [shape: bf16[128,128], index: 1, kind: input, shape index: {}]   ;;  %s386_s2 = inlined_call_operand.hbm [shape: bf16[16,128], index: 2, kind: output, shape index: {}]  }
   0x1   :  { %8 = vsyncpa [#allocation6], 0 }
   0x2   :  { %9 = vsyncpa [#allocation4], 0  ;;  %s317_s9 = smov [#allocation2]   ;;  %s245_s13 = scalar_lea.hbm %s384_s0, 128 }
   0x3   :  { %s15_s10 = sshll.u32 %s317_s9, 4  ;;  %p246_p0 = scmp.ne.s32.totalorder %s384_s0, %s245_s13  ;;  %s16_s10 = int_to_ptr.vmem [resolvable:$true] %s15_s10 }
   0x4   :  { %p249_p1 = scmp.lt.u32.totalorder %s245_s13, %s384_s0 }
   0x6   :  { %p251_p2 = pnand %p249_p1, %p246_p0 }
   0x8   :  { %254 = shalt.err (!%p251_p2)
}
   0x9   :  { %s255_s18 = scalar_lea.vmem %s16_s10, 128  ;;  %p260_p4 = scmp.lt.s32.totalorder %s16_s10, %s16_s10 }
   0xa   :  { %p256_p3 = scmp.ne.s32.totalorder %s16_s10, %s255_s18  ;;  %p261_p5 = scmp.lt.s32.totalorder %s255_s18, %s255_s18 }
   0xc   :  { %p262_p6 = por %p261_p5, %p260_p4 }
   0xe   :  { %p263_p7 = pnand %p262_p6, %p256_p3 }
  0x10   :  { %266 = shalt.err (!%p263_p7)
}
  0x11   :  { %s318_s19 = smov 64   ;;  %s319_s20 = smov 4  }
  0x12   :  { %21 = dma.hbm_to_vmem [thread:$0]  %s384_s0, 128, %s16_s10, [#allocation3], %s318_s19, %s318_s19, %s319_s20  }
  0x13   :  { %s320_s23 = smov [#allocation5]   ;;  %s267_s27 = scalar_lea.hbm %s385_s1, 1024 }
  0x14   :  { %s27_s24 = sshll.u32 %s320_s23, 4  ;;  %p268_p8 = scmp.ne.s32.totalorder %s385_s1, %s267_s27  ;;  %s28_s24 = int_to_ptr.vmem [resolvable:$true] %s27_s24 }
  0x15   :  { %p271_p9 = scmp.lt.u32.totalorder %s267_s27, %s385_s1 }
  0x17   :  { %p273_p10 = pnand %p271_p9, %p268_p8 }
  0x19   :  { %276 = shalt.err (!%p273_p10)
}
  0x1a   :  { %s277_s4 = scalar_lea.vmem %s28_s24, 1024  ;;  %p282_p12 = scmp.lt.s32.totalorder %s28_s24, %s28_s24 }
  0x1b   :  { %p278_p11 = scmp.ne.s32.totalorder %s28_s24, %s277_s4  ;;  %p283_p13 = scmp.lt.s32.totalorder %s277_s4, %s277_s4 }
  0x1d   :  { %p284_p0 = por %p283_p13, %p282_p12 }
  0x1f   :  { %p285_p1 = pnand %p284_p0, %p278_p11 }
  0x21   :  { %288 = shalt.err (!%p285_p1)
}
  0x22   :  { %33 = dma.hbm_to_vmem [thread:$0]  %s385_s1, 1024, %s28_s24, [#allocation6], %s318_s19, %s318_s19, %s319_s20  }
  0x23   :  { %311 = dma.done.wait [#allocation3], 128  }
  0x24   :  { %312 = vsyncadd [#allocation3], 4294967168 }
  0x25   :  { %313 = dma.done.wait [#allocation6], 1024  }
  0x26   :  { %314 = vsyncadd [#allocation6], 4294966272  ;;  %v321_v0 = vmov 0.0   ;;  %vm322_vm0 = vmmov 0   ;;  %v236_v1 = vld [vmem:[#allocation5] sm:$0xff]   ;;  %v237_v2 = vld [vmem:[#allocation5 + $0x8] sm:$0xff]  }
  0x27   :  { %209 = vmatprep.subr.bf16.mxu0 %v321_v0  ;;  %225 = vmatprep.mubr.msk.bf16.mxu0 %vm322_vm0, %v321_v0  ;;  %v238_v3 = vld [vmem:[#allocation5 + $0x10] sm:$0xff]   ;;  %v239_v4 = vld [vmem:[#allocation5 + $0x18] sm:$0xff]   ;;  %v240_v5 = vld [vmem:[#allocation5 + $0x20] sm:$0xff]   ;;  %s323_s1 = smov [#allocation7]  }
  0x28   :  { %210 = vmatpush3.bf16.msra.mxu0 %v236_v1  ;;  %v241_v6 = vld [vmem:[#allocation5 + $0x28] sm:$0xff]   ;;  %v242_v7 = vld [vmem:[#allocation5 + $0x30] sm:$0xff]   ;;  %v243_v8 = vld [vmem:[#allocation5 + $0x38] sm:$0xff]   ;;  %s169_s6 = sshll.u32 %s323_s1, 4  ;;  %s170_s6 = int_to_ptr.vmem [resolvable:$true] %s169_s6 }
  0x29   :  { %211 = vmatprep.subr.bf16.mxu0 %v321_v0  ;;  %v244_v9 = vld [vmem:[#allocation2] sm:$0xff]   ;;  %s289_s7 = scalar_lea.vmem %s170_s6, 128  ;;  %p294_p3 = scmp.lt.s32.totalorder %s170_s6, %s170_s6 }
  0x2a   :  { %p290_p2 = scmp.ne.s32.totalorder %s170_s6, %s289_s7  ;;  %p295_p4 = scmp.lt.s32.totalorder %s289_s7, %s289_s7 }
  0x2c   :  { %212 = vmatpush3.bf16.msra.mxu0 %v237_v2  ;;  %p296_p5 = por %p295_p4, %p294_p3 }
  0x2d   :  { %213 = vmatprep.subr.bf16.mxu0 %v321_v0 }
  0x2e   :  { %p297_p6 = pnand %p296_p5, %p290_p2 }
  0x30   :  { %214 = vmatpush3.bf16.msra.mxu0 %v238_v3 }
  0x31   :  { %215 = vmatprep.subr.bf16.mxu0 %v321_v0 }
  0x34   :  { %216 = vmatpush3.bf16.msra.mxu0 %v239_v4 }
  0x35   :  { %217 = vmatprep.subr.bf16.mxu0 %v321_v0 }
  0x38   :  { %218 = vmatpush3.bf16.msra.mxu0 %v240_v5 }
  0x39   :  { %219 = vmatprep.subr.bf16.mxu0 %v321_v0 }
  0x3c   :  { %220 = vmatpush3.bf16.msra.mxu0 %v241_v6 }
  0x3d   :  { %221 = vmatprep.subr.bf16.mxu0 %v321_v0 }
  0x40   :  { %222 = vmatpush3.bf16.msra.mxu0 %v242_v7 }
  0x41   :  { %223 = vmatprep.subr.bf16.mxu0 %v321_v0 }
  0x44   :  { %224 = vmatpush3.bf16.msra.mxu0 %v243_v8 }
  0x47   :  { %226 = vmatmul.mubr.bf16.vlgmr.msra.gmra.mrb[0].mxu0 %v244_v9 }
 0x11a   :  { %v147_v10 = vpop.f32.mrb[0].mxu0 }
 0x11b   :  { %v227_v11 = vpop.f32.mrb[1].mxu0 }
 0x11c   :  { %v150_v12 = vpop.f32.mrb[2].mxu0 }
 0x11d   :  { %v198_v13 = vpack.c.bf16 %v150_v12, %v147_v10  ;;  %v228_v14 = vpop.f32.mrb[3].mxu0 }
 0x11f   :  { %199 = vst [vmem:[#allocation7] sm:$0xff] %v198_v13  }
 0x120   :  { %300 = shalt.err (!%p297_p6)
}
 0x121   :  { %s301_s10 = scalar_lea.hbm %s386_s2, 128 }
 0x122   :  { %p302_p7 = scmp.ne.s32.totalorder %s386_s2, %s301_s10  ;;  %p305_p8 = scmp.lt.u32.totalorder %s301_s10, %s386_s2 }
 0x124   :  { %p307_p9 = pnand %p305_p8, %p302_p7 }
 0x126   :  { %310 = shalt.err (!%p307_p9)
}
 0x127   :  { %175 = dma.vmem_to_hbm [thread:$0]  %s170_s6, 128, %s386_s2, [#allocation4], %s318_s19, %s318_s19, %s319_s20  }
 0x128   :  { %315 = dma.done.wait [#allocation4], 128  }
 0x129   :  { %316 = vsyncadd [#allocation4], 4294967168 }
 0x12a   :  { %179 = vsyncpa [#allocation3], 1 }
 0x12b   :  { %180 = vsyncpa [#allocation6], 1 }
 0x12c   :  { %181 = vsyncpa [#allocation4], 1 }

</bundles_post_ra>
